<compile_context>
chip_gen: v5e
topology: v5e:2x2
jax: 0.10.0
libtpu: 0.0.40
codegen_flags: <defaults>
</compile_context>

<pallas_src>
import jax
import jax.numpy as jnp
from jax import lax
from jax.experimental import pallas as pl
from jax.experimental.pallas import tpu as pltpu


def _round_up(x: int, m: int) -> int:
    return (x + m - 1) // m * m


def depnet_prepare_kernel(deps_ref, starts_ref, ends_ref, emb_ref, w_ref, b_ref,
                          out_ref, acc_ref, mem_ref):
    """Grid = (bag tiles i, vocab tiles k).  k is the reduction axis.

    deps_ref   : (N_pad, 1)     int32  (padding tokens are -1, never match)
    starts_ref : (TB, 1)        int32  bag start offsets for this bag tile
    ends_ref   : (TB, 1)        int32  bag end offsets   for this bag tile
    emb_ref    : (TV, H_pad)    bf16   one vocab tile of the embedding table
    w_ref      : (H_pad, C_pad) f32
    b_ref      : (1, C_pad)     f32
    out_ref    : (TB, C_pad)    f32
    acc_ref    : (TB, H_pad)    f32    pooled-sum accumulator (scratch)
    mem_ref    : (TB, N_pad)    bf16   membership mask (scratch, built at k==0)
    """
    k = pl.program_id(1)
    nk = pl.num_programs(1)

    tb, n_pad = mem_ref.shape
    tv = emb_ref.shape[0]

    @pl.when(k == 0)
    def _():
        acc_ref[...] = jnp.zeros_like(acc_ref)
        # membership[b, j] = 1 iff token j belongs to bag b of this bag tile.
        # Depends only on the bag tile (i), so build it once per bag tile and
        # reuse across all vocab tiles.  Compares stay in int32 and a single
        # cast packs to bf16 (cheap path on v5e: no bf16 VALU, one vst slot).
        j_ids = lax.broadcasted_iota(jnp.int32, (tb, n_pad), 1)
        mem_ref[...] = ((j_ids >= starts_ref[...]) &
                        (j_ids < ends_ref[...])).astype(jnp.bfloat16)

    # ---- EmbeddingBag(mode='mean') sum, as two bf16 MXU matmuls ---------------
    # onehot[j, v] = 1 iff deps[j] == (global vocab id of column v in this tile).
    # OOB / padding indices simply match no column (no memory access involved).
    v_ids = lax.broadcasted_iota(jnp.int32, (n_pad, tv), 1) + k * tv
    onehot = (deps_ref[...] == v_ids).astype(jnp.bfloat16)            # (N_pad, TV)

    # counts[b, v] = multiplicity of vocab word v inside bag b (exact small ints).
    counts = jnp.dot(mem_ref[...], onehot,
                     preferred_element_type=jnp.float32)              # (TB, TV) f32
    # NOTE: bf16 represents integers exactly up to 256; per-(bag, word)
    # multiplicities beyond that would round (irrelevant for dep-word bags).
    acc_ref[...] += jnp.dot(counts.astype(jnp.bfloat16), emb_ref[...],
                            preferred_element_type=jnp.float32)       # (TB, H_pad)

    # ---- Mean + Linear head on the last vocab tile ----------------------------
    # Dropout is identity at inference.  Head stays f32 (tiny matmul, accuracy).
    @pl.when(k == nk - 1)
    def _():
        cnt = jnp.maximum(ends_ref[...] - starts_ref[...], 1).astype(jnp.float32)
        pooled = acc_ref[...] / cnt                                   # (TB, H_pad)
        out_ref[...] = (jnp.dot(pooled, w_ref[...],
                                preferred_element_type=jnp.float32)
                        + b_ref[...])


def prepare_depnet_params(emb, w, bias, *, vocab_tile=256):
    """One-time padding / dtype conversion of the parameters (hoisted out of the
    per-call path: avoids re-materializing the O(V*H) padded table every call)."""
    vocab, hidden = int(emb.shape[0]), int(emb.shape[1])
    n_cat = int(w.shape[1])

    v_pad = _round_up(vocab, vocab_tile)
    h_pad = _round_up(max(hidden, 128), 128)
    c_pad = _round_up(max(n_cat, 128), 128)

    emb_p = (jnp.zeros((v_pad, h_pad), jnp.bfloat16)
             .at[:vocab, :hidden].set(emb.astype(jnp.bfloat16)))
    w_p = jnp.zeros((h_pad, c_pad), jnp.float32).at[:hidden, :n_cat].set(w)
    b_p = jnp.zeros((1, c_pad), jnp.float32).at[:, :n_cat].set(bias)

    return dict(emb=emb_p, w=w_p, b=b_p, vocab_tile=vocab_tile,
                vocab=vocab, hidden=hidden, n_cat=n_cat)


def depnet_prepare(deps, offsets, params, *, bag_tile=None):
    """EmbeddingBag(mean) + Linear forward (inference).  Pads deps/offsets only."""
    emb_p, w_p, b_p = params["emb"], params["w"], params["b"]
    vocab_tile = params["vocab_tile"]
    n_cat = params["n_cat"]
    v_pad, h_pad = int(emb_p.shape[0]), int(emb_p.shape[1])
    c_pad = int(w_p.shape[1])

    n_tok = int(deps.shape[0])
    n_bags = int(offsets.shape[0])

    # Bag tiling: one big tile by default (table streamed from HBM exactly once,
    # full MXU M occupancy).  On v7x with small B pass bag_tile = b_pad // 2 to
    # keep both TensorCores busy (costs one extra pass over the table).
    b_pad = _round_up(n_bags, 8)
    if bag_tile is None:
        bag_tile = min(128, b_pad)
    bag_tile = _round_up(min(bag_tile, b_pad), 8)
    b_pad = _round_up(b_pad, bag_tile)
    n_pad = _round_up(max(n_tok, 128), 128)

    # Per-bag [start, end) ranges; padded bags are empty ([0, 0)).
    offsets = offsets.astype(jnp.int32)
    ends_real = jnp.concatenate([offsets[1:], jnp.array([n_tok], jnp.int32)])
    starts_p = jnp.zeros((b_pad, 1), jnp.int32).at[:n_bags, 0].set(offsets)
    ends_p = jnp.zeros((b_pad, 1), jnp.int32).at[:n_bags, 0].set(ends_real)

    # Padding tokens get index -1 (matches no vocab column).
    deps_p = jnp.full((n_pad, 1), -1, jnp.int32).at[:n_tok, 0].set(
        deps.astype(jnp.int32))

    grid = (b_pad // bag_tile, v_pad // vocab_tile)

    # Explicit VMEM budget (double-buffered blocks + scratch + mask temporaries),
    # with 2x headroom, clamped to v7x's 64 MiB physical ceiling.
    vmem_bytes = 2 * (
        2 * vocab_tile * h_pad * 2            # emb tile double buffer (bf16)
        + 2 * n_pad * 4                       # deps block
        + 2 * (h_pad * c_pad + c_pad) * 4     # W, b blocks
        + 4 * bag_tile * 4                    # starts / ends blocks
        + bag_tile * h_pad * 4                # acc scratch (f32)
        + bag_tile * n_pad * 2                # membership scratch (bf16)
        + n_pad * vocab_tile * (4 + 2)        # onehot iota + bf16 mask temps
        + bag_tile * vocab_tile * 4           # counts
        + 2 * bag_tile * c_pad * 4)           # output double buffer
    vmem_limit = int(max(8 << 20, min(64 << 20, vmem_bytes)))

    out = pl.pallas_call(
        depnet_prepare_kernel,
        out_shape=jax.ShapeDtypeStruct((b_pad, c_pad), jnp.float32),
        grid_spec=pltpu.PrefetchScalarGridSpec(
            num_scalar_prefetch=0,
            grid=grid,
            in_specs=[
                pl.BlockSpec((n_pad, 1), lambda i, k: (0, 0)),           # deps
                pl.BlockSpec((bag_tile, 1), lambda i, k: (i, 0)),        # bag starts
                pl.BlockSpec((bag_tile, 1), lambda i, k: (i, 0)),        # bag ends
                pl.BlockSpec((vocab_tile, h_pad), lambda i, k: (k, 0)),  # emb tile
                pl.BlockSpec((h_pad, c_pad), lambda i, k: (0, 0)),       # linear W
                pl.BlockSpec((1, c_pad), lambda i, k: (0, 0)),           # linear b
            ],
            out_specs=pl.BlockSpec((bag_tile, c_pad), lambda i, k: (i, 0)),
            scratch_shapes=[
                pltpu.VMEM((bag_tile, h_pad), jnp.float32),    # pooled-sum acc
                pltpu.VMEM((bag_tile, n_pad), jnp.bfloat16),   # membership mask
            ],
        ),
        compiler_params=pltpu.CompilerParams(
            dimension_semantics=("parallel", "arbitrary"),
            vmem_limit_bytes=vmem_limit),
    )(deps_p, starts_p, ends_p, emb_p, w_p, b_p)

    return out[:n_bags, :n_cat]


def reference_forward(deps, offsets, emb, w, bias):
    """Pure-JAX reference (EmbeddingBag(mean) + Linear), for correctness check."""
    n_tok = deps.shape[0]
    n_bags = offsets.shape[0]
    ends = list(offsets[1:].tolist()) + [n_tok]
    pooled = []
    for b in range(n_bags):
        s, e = int(offsets[b]), int(ends[b])
        if e > s:
            pooled.append(jnp.mean(emb[deps[s:e]], axis=0))
        else:
            pooled.append(jnp.zeros((emb.shape[1],), jnp.float32))
    pooled = jnp.stack(pooled)
    return pooled @ w + bias


if __name__ == "__main__":
    # Small shapes consistent with the module's forward.
    num_dep_words = 200     # V
    hidden_dim = 32         # H
    num_categories = 4      # C
    num_bags = 16           # B (batch of "deps" bags)

    # Deterministic, variable bag sizes (first bag intentionally empty).
    sizes = [0, 1, 2, 3, 4, 1, 2, 3, 4, 1, 2, 3, 4, 1, 2, 3]
    total_deps = int(sum(sizes))                                  # N = 36
    deps_offsets = jnp.concatenate(
        [jnp.zeros((1,), jnp.int32),
         jnp.cumsum(jnp.array(sizes, jnp.int32))[:-1]])           # (B,)

    key = jax.random.PRNGKey(0)
    k_deps, k_emb, k_w, k_b = jax.random.split(key, 4)

    deps = jax.random.randint(k_deps, (total_deps,), 0, num_dep_words,
                              dtype=jnp.int32)

    # Deterministic parameter init (synthetic, not a checkpoint).
    emb_table = (jax.random.normal(k_emb, (num_dep_words, hidden_dim),
                                   dtype=jnp.float32) * 0.02)
    lin_w = (jax.random.normal(k_w, (hidden_dim, num_categories),
                               dtype=jnp.float32) * 0.1)          # (H, C)
    lin_b = jax.random.normal(k_b, (1, num_categories),
                              dtype=jnp.float32) * 0.1            # (1, C)

    # One-time parameter preparation (padding + bf16 table), then the call.
    params = prepare_depnet_params(emb_table, lin_w, lin_b, vocab_tile=256)
    out = depnet_prepare(deps, deps_offsets, params)
    out = jax.block_until_ready(out)

    ref = reference_forward(deps, deps_offsets, emb_table, lin_w, lin_b)
    assert out.shape == (num_bags, num_categories)
    # Tolerance loosened vs. the f32 reference because the kernel streams the
    # embedding table in bf16 (accumulation stays f32).
    assert jnp.allclose(out, ref, atol=1e-2, rtol=1e-2), (out, ref)

    print("KERNEL_OK")
</pallas_src>

<mosaic_0001>
module attributes {stable_mosaic.version = 11 : i64} {
  func.func @depnet_prepare_kernel(%arg0: i32, %arg1: i32, %arg2: memref<128x1xi32, #tpu.memory_space<vmem>>, %arg3: memref<16x1xi32, #tpu.memory_space<vmem>>, %arg4: memref<16x1xi32, #tpu.memory_space<vmem>>, %arg5: memref<256x128xbf16, #tpu.memory_space<vmem>>, %arg6: memref<128x128xf32, #tpu.memory_space<vmem>>, %arg7: memref<1x128xf32, #tpu.memory_space<vmem>>, %arg8: memref<16x128xf32, #tpu.memory_space<vmem>>, %arg9: memref<16x128xf32, #tpu.memory_space<vmem>>, %arg10: memref<16x128xbf16, #tpu.memory_space<vmem>>) attributes {dimension_semantics = [#tpu.dimension_semantics<parallel>, #tpu.dimension_semantics<arbitrary>], iteration_bounds = array<i64: 1, 1>, scalar_prefetch = 0 : i64, scratch_operands = 2 : i64, tpu.core_type = #tpu.core_type<tc>, window_params = [{pipeline_mode = #tpu.pipeline_mode<synchronous>, transform_indices = @transform_0, window_bounds = array<i64: 128, 1>}, {transform_indices = @transform_1, window_bounds = array<i64: 16, 1>}, {transform_indices = @transform_2, window_bounds = array<i64: 16, 1>}, {transform_indices = @transform_3, window_bounds = array<i64: 256, 128>}, {pipeline_mode = #tpu.pipeline_mode<synchronous>, transform_indices = @transform_4, window_bounds = array<i64: 128, 128>}, {pipeline_mode = #tpu.pipeline_mode<synchronous>, transform_indices = @transform_5, window_bounds = array<i64: 1, 128>}, {transform_indices = @transform_6, window_bounds = array<i64: 16, 128>}]} {
    %c0_i32 = arith.constant 0 : i32
    %0 = arith.cmpi eq, %arg1, %c0_i32 : i32
    %1 = arith.extui %0 : i1 to i32
    %c0_i32_0 = arith.constant 0 : i32
    %2 = arith.cmpi ne, %1, %c0_i32_0 : i32
    scf.if %2 {
      %cst_13 = arith.constant 0.000000e+00 : f32
      %24 = vector.broadcast %cst_13 : f32 to vector<16x128xf32>
      %c0_14 = arith.constant 0 : index
      %c0_15 = arith.constant 0 : index
      %25 = vector.load %arg9[%c0_14, %c0_15] : memref<16x128xf32, #tpu.memory_space<vmem>>, vector<16x128xf32>
      tpu.vector_store %arg9[%c0_14, %c0_15], %24 {strides = array<i32>} : memref<16x128xf32, #tpu.memory_space<vmem>>, vector<16x128xf32>,
      %26 = tpu.iota {dimensions = array<i32: 1>} : vector<16x128xi32>
      %c0_16 = arith.constant 0 : index
      %c0_17 = arith.constant 0 : index
      %27 = vector.load %arg3[%c0_16, %c0_17] : memref<16x1xi32, #tpu.memory_space<vmem>>, vector<16x1xi32>
      %28 = vector.broadcast %27 : vector<16x1xi32> to vector<16x128xi32>
      %29 = arith.cmpi sge, %26, %28 : vector<16x128xi32>
      %c0_18 = arith.constant 0 : index
      %c0_19 = arith.constant 0 : index
      %30 = vector.load %arg4[%c0_18, %c0_19] : memref<16x1xi32, #tpu.memory_space<vmem>>, vector<16x1xi32>
      %31 = vector.broadcast %30 : vector<16x1xi32> to vector<16x128xi32>
      %32 = arith.cmpi slt, %26, %31 : vector<16x128xi32>
      %33 = arith.andi %29, %32 : vector<16x128xi1>
      %34 = arith.extui %33 : vector<16x128xi1> to vector<16x128xi32>
      %35 = arith.sitofp %34 : vector<16x128xi32> to vector<16x128xf32>
      %36 = arith.truncf %35 : vector<16x128xf32> to vector<16x128xbf16>
      %c0_20 = arith.constant 0 : index
      %c0_21 = arith.constant 0 : index
      %37 = vector.load %arg10[%c0_20, %c0_21] : memref<16x128xbf16, #tpu.memory_space<vmem>>, vector<16x128xbf16>
      tpu.vector_store %arg10[%c0_20, %c0_21], %36 {strides = array<i32>} : memref<16x128xbf16, #tpu.memory_space<vmem>>, vector<16x128xbf16>,
    } else {
    }
    %3 = tpu.iota {dimensions = array<i32: 1>} : vector<128x256xi32>
    %c256_i32 = arith.constant 256 : i32
    %4 = arith.muli %arg1, %c256_i32 : i32
    %5 = vector.broadcast %4 : i32 to vector<128x256xi32>
    %6 = arith.addi %3, %5 : vector<128x256xi32>
    %c0 = arith.constant 0 : index
    %c0_1 = arith.constant 0 : index
    %7 = vector.load %arg2[%c0, %c0_1] : memref<128x1xi32, #tpu.memory_space<vmem>>, vector<128x1xi32>
    %8 = vector.broadcast %7 : vector<128x1xi32> to vector<128x256xi32>
    %9 = arith.cmpi eq, %8, %6 : vector<128x256xi32>
    %10 = arith.extui %9 : vector<128x256xi1> to vector<128x256xi32>
    %11 = arith.sitofp %10 : vector<128x256xi32> to vector<128x256xf32>
    %12 = arith.truncf %11 : vector<128x256xf32> to vector<128x256xbf16>
    %c0_2 = arith.constant 0 : index
    %c0_3 = arith.constant 0 : index
    %13 = vector.load %arg10[%c0_2, %c0_3] : memref<16x128xbf16, #tpu.memory_space<vmem>>, vector<16x128xbf16>
    %cst = arith.constant dense<0.000000e+00> : vector<16x256xf32>
    %14 = tpu.matmul %13, %12, %cst {dimension_numbers = #tpu.dot_dimension_numbers<[1], [0], [0], [1], [0, 0, 1, 1], [], []>} : vector<16x128xbf16>, vector<128x256xbf16>, vector<16x256xf32> -> vector<16x256xf32>
    %c0_4 = arith.constant 0 : index
    %c0_5 = arith.constant 0 : index
    %15 = vector.load %arg9[%c0_4, %c0_5] : memref<16x128xf32, #tpu.memory_space<vmem>>, vector<16x128xf32>
    %16 = arith.truncf %14 : vector<16x256xf32> to vector<16x256xbf16>
    %c0_6 = arith.constant 0 : index
    %c0_7 = arith.constant 0 : index
    %17 = vector.load %arg5[%c0_6, %c0_7] : memref<256x128xbf16, #tpu.memory_space<vmem>>, vector<256x128xbf16>
    %cst_8 = arith.constant dense<0.000000e+00> : vector<16x128xf32>
    %18 = tpu.matmul %16, %17, %cst_8 {dimension_numbers = #tpu.dot_dimension_numbers<[1], [0], [0], [1], [0, 0, 1, 1], [], []>} : vector<16x256xbf16>, vector<256x128xbf16>, vector<16x128xf32> -> vector<16x128xf32>
    %19 = arith.addf %15, %18 : vector<16x128xf32>
    %c0_9 = arith.constant 0 : index
    %c0_10 = arith.constant 0 : index
    %20 = vector.load %arg9[%c0_9, %c0_10] : memref<16x128xf32, #tpu.memory_space<vmem>>, vector<16x128xf32>
    tpu.vector_store %arg9[%c0_9, %c0_10], %19 {strides = array<i32>} : memref<16x128xf32, #tpu.memory_space<vmem>>, vector<16x128xf32>,
    %c0_i32_11 = arith.constant 0 : i32
    %21 = arith.cmpi eq, %arg1, %c0_i32_11 : i32
    %22 = arith.extui %21 : i1 to i32
    %c0_i32_12 = arith.constant 0 : i32
    %23 = arith.cmpi ne, %22, %c0_i32_12 : i32
    scf.if %23 {
      %c0_13 = arith.constant 0 : index
      %c0_14 = arith.constant 0 : index
      %24 = vector.load %arg4[%c0_13, %c0_14] : memref<16x1xi32, #tpu.memory_space<vmem>>, vector<16x1xi32>
      %c0_15 = arith.constant 0 : index
      %c0_16 = arith.constant 0 : index
      %25 = vector.load %arg3[%c0_15, %c0_16] : memref<16x1xi32, #tpu.memory_space<vmem>>, vector<16x1xi32>
      %26 = arith.subi %24, %25 : vector<16x1xi32>
      %c1_i32 = arith.constant 1 : i32
      %27 = vector.broadcast %c1_i32 : i32 to vector<16x1xi32>
      %28 = arith.maxsi %26, %27 : vector<16x1xi32>
      %29 = arith.sitofp %28 : vector<16x1xi32> to vector<16x1xf32>
      %c0_17 = arith.constant 0 : index
      %c0_18 = arith.constant 0 : index
      %30 = vector.load %arg9[%c0_17, %c0_18] : memref<16x128xf32, #tpu.memory_space<vmem>>, vector<16x128xf32>
      %31 = vector.broadcast %29 : vector<16x1xf32> to vector<16x128xf32>
      %32 = arith.divf %30, %31 : vector<16x128xf32>
      %c0_19 = arith.constant 0 : index
      %c0_20 = arith.constant 0 : index
      %33 = vector.load %arg6[%c0_19, %c0_20] : memref<128x128xf32, #tpu.memory_space<vmem>>, vector<128x128xf32>
      %cst_21 = arith.constant dense<0.000000e+00> : vector<16x128xf32>
      %34 = tpu.matmul %32, %33, %cst_21 {dimension_numbers = #tpu.dot_dimension_numbers<[1], [0], [0], [1], [0, 0, 1, 1], [], []>} : vector<16x128xf32>, vector<128x128xf32>, vector<16x128xf32> -> vector<16x128xf32>
      %c0_22 = arith.constant 0 : index
      %c0_23 = arith.constant 0 : index
      %35 = vector.load %arg7[%c0_22, %c0_23] : memref<1x128xf32, #tpu.memory_space<vmem>>, vector<1x128xf32>
      %36 = vector.broadcast %35 : vector<1x128xf32> to vector<16x128xf32>
      %37 = arith.addf %34, %36 : vector<16x128xf32>
      %c0_24 = arith.constant 0 : index
      %c0_25 = arith.constant 0 : index
      %38 = vector.load %arg8[%c0_24, %c0_25] : memref<16x128xf32, #tpu.memory_space<vmem>>, vector<16x128xf32>
      tpu.vector_store %arg8[%c0_24, %c0_25], %37 {strides = array<i32>} : memref<16x128xf32, #tpu.memory_space<vmem>>, vector<16x128xf32>,
    } else {
    }
    return
  }
  func.func @transform_0(%arg0: i32, %arg1: i32) -> (i32, i32) {
    %c0_i32 = arith.constant 0 : i32
    %c0_i32_0 = arith.constant 0 : i32
    %c0_i32_1 = arith.constant 0 : i32
    return %c0_i32, %c0_i32_0 : i32, i32
  }
  func.func @transform_1(%arg0: i32, %arg1: i32) -> (i32, i32) {
    %c0_i32 = arith.constant 0 : i32
    %c0_i32_0 = arith.constant 0 : i32
    return %arg0, %c0_i32 : i32, i32
  }
  func.func @transform_2(%arg0: i32, %arg1: i32) -> (i32, i32) {
    %c0_i32 = arith.constant 0 : i32
    %c0_i32_0 = arith.constant 0 : i32
    return %arg0, %c0_i32 : i32, i32
  }
  func.func @transform_3(%arg0: i32, %arg1: i32) -> (i32, i32) {
    %c0_i32 = arith.constant 0 : i32
    %c0_i32_0 = arith.constant 0 : i32
    return %arg1, %c0_i32 : i32, i32
  }
  func.func @transform_4(%arg0: i32, %arg1: i32) -> (i32, i32) {
    %c0_i32 = arith.constant 0 : i32
    %c0_i32_0 = arith.constant 0 : i32
    %c0_i32_1 = arith.constant 0 : i32
    return %c0_i32, %c0_i32_0 : i32, i32
  }
  func.func @transform_5(%arg0: i32, %arg1: i32) -> (i32, i32) {
    %c0_i32 = arith.constant 0 : i32
    %c0_i32_0 = arith.constant 0 : i32
    %c0_i32_1 = arith.constant 0 : i32
    return %c0_i32, %c0_i32_0 : i32, i32
  }
  func.func @transform_6(%arg0: i32, %arg1: i32) -> (i32, i32) {
    %c0_i32 = arith.constant 0 : i32
    %c0_i32_0 = arith.constant 0 : i32
    return %arg0, %c0_i32 : i32, i32
  }
}

</mosaic_0001>

<bundles_post_ra>
// kernel: tpu_custom_call.1
= control target key start
LH: loop header
LB: loop body
LE: loop exit
PB: predicated region body
PF: predicated region fallthrough
CT: control target
= control target key end

     0   :  { %11 = vsyncpa [#allocation5], 0  ;;  %s1041_s0 = inlined_call_operand.vmem [shape: s32[128,1], index: 0, kind: input, shape index: {}]   ;;  %s1042_s1 = inlined_call_operand.vmem [shape: s32[16,1], index: 1, kind: input, shape index: {}]   ;;  %s1043_s2 = inlined_call_operand.vmem [shape: s32[16,1], index: 2, kind: input, shape index: {}]   ;;  %s1044_s3 = inlined_call_operand.vmem [shape: bf16[256,128], index: 3, kind: input, shape index: {}]   ;;  %s1045_s4 = inlined_call_operand.hbm [shape: f32[128,128], index: 4, kind: input, shape index: {}]   ;;  %s1046_s5 = inlined_call_operand.vmem [shape: f32[1,128], index: 5, kind: input, shape index: {}]   ;;  %s1047_s6 = inlined_call_operand.hbm [shape: f32[16,128], index: 6, kind: output, shape index: {}]  }
   0x1   :  { %12 = vsyncpa [#allocation6], 0  ;;  %s25_s23 = sshll.u32 %s1045_s4, 4  ;;  %s819_s24 = smov [#allocation4]   ;;  %s26_s23 = int_to_ptr.hbm [resolvable:$true] %s25_s23 }
   0x2   :  { %s27_s25 = sshll.u32 %s819_s24, 4  ;;  %s820_s26 = smov 128   ;;  %s28_s25 = int_to_ptr.vmem [resolvable:$true] %s27_s25 }
   0x3   :  { %s821_s27 = smov 8  }
   0x4   :  { %33 = dma.hbm_to_vmem [thread:$0]  %s26_s23, 2048, %s28_s25, [#allocation5], %s820_s26, %s820_s26, %s821_s27  }
   0x5   :  { %815 = dma.done.wait [#allocation5], 2048  }
   0x6   :  { %816 = vsyncadd [#allocation5], 4294965248  ;;  %v822_v0 = vmov 0   ;;  %v99_v1 = vld [vmem:[%s1041_s0 + $0x70] sm:$0xff]  ;;  %v97_v2 = vld [vmem:[%s1041_s0 + $0x60] sm:$0xff]  ;;  %v46_v28 = vlaneseq  ;;  %v824_v46 = vmov 0.0  }
   0x7   :  { %761 = vset.pattern.permute.xlu2 %v822_v0  ;;  %760 = vset.pattern.permute.xlu1 %v822_v0  ;;  %v95_v3 = vld [vmem:[%s1041_s0 + $0x50] sm:$0xff]  ;;  %v100_v4 = vld [vmem:[%s1041_s0 + $0x78] sm:$0xff]  ;;  %v98_v5 = vld [vmem:[%s1041_s0 + $0x68] sm:$0xff]  ;;  %v823_v37 = vmov 1.0|1.0   ;;  %s825_s24 = smov [#allocation7]  }
   0x8   :  { %759 = vset.pattern.permute.xlu0 %v822_v0  ;;  %138 = vperm.xlu1 %760, %v97_v2   ;;  %v96_v6 = vld [vmem:[%s1041_s0 + $0x58] sm:$0xff]  ;;  %v94_v7 = vld [vmem:[%s1041_s0 + $0x48] sm:$0xff]  ;;  %v93_v8 = vld [vmem:[%s1041_s0 + $0x40] sm:$0xff]  ;;  %v927_v32 = vand.u32 127, %v46_v28  ;;  %s567_s25 = sshll.u32 %s825_s24, 4  ;;  %s569_s4 = sshll.u32 %s1047_s6, 4  ;;  %s568_s25 = int_to_ptr.vmem [resolvable:$true] %s567_s25  ;;  %s570_s4 = int_to_ptr.hbm [resolvable:$true] %s569_s4 }
   0x9   :  { %144 = vperm.xlu0 %759, %v99_v1   ;;  %132 = vperm.xlu2 %761, %v95_v3   ;;  %v91_v9 = vld [vmem:[%s1041_s0 + $0x30] sm:$0xff]  ;;  %v92_v10 = vld [vmem:[%s1041_s0 + $0x38] sm:$0xff]  ;;  %v48_v11 = vld [vmem:[%s1042_s1] sm:$0xff] }
   0xa   :  { %v49_v12 = vld [vmem:[%s1042_s1 + $0x8] sm:$0xff]  ;;  %v58_v13 = vld [vmem:[%s1043_s2] sm:$0xff]  ;;  %v87_v18 = vld [vmem:[%s1041_s0 + $0x10] sm:$0xff]  ;;  %v930_v33 = vadd.s32 128, %v927_v32 }
   0xb   :  { %v59_v14 = vld [vmem:[%s1043_s2 + $0x8] sm:$0xff]  ;;  %v89_v15 = vld [vmem:[%s1041_s0 + $0x20] sm:$0xff]  ;;  %v468_v16 = vsub.s32 %v58_v13, %v48_v11  ;;  %v88_v19 = vld [vmem:[%s1041_s0 + $0x18] sm:$0xff] }
   0xc   :  { %v90_v17 = vld [vmem:[%s1041_s0 + $0x28] sm:$0xff]  ;;  %v469_v21 = vsub.s32 %v59_v14, %v49_v12  ;;  %v85_v22 = vld [vmem:[%s1041_s0] sm:$0xff]  ;;  %v724_v48 = vld [vmem:[%s1044_s3 + $0x38] sm:$0xff] }
   0xd   :  { %vm470_vm0 = vcmp.gt.s32.totalorder %v468_v16, 1  ;;  %v86_v24 = vld [vmem:[%s1041_s0 + $0x8] sm:$0xff]  ;;  %v732_v49 = vld [vmem:[%s1044_s3 + $0x78] sm:$0xff]  ;;  %429 = vmatpush.bf16.msra.mxu2 %v724_v48  ;;  %v723_v52 = vld [vmem:[%s1044_s3 + $0x30] sm:$0xff] }
   0xe   :  { %v471_v20 = vsel %vm470_vm0, %v468_v16, 1  ;;  %vm472_vm1 = vcmp.gt.s32.totalorder %v469_v21, 1  ;;  %443 = vmatpush.bf16.msra.mxu3 %v732_v49  ;;  %v731_v53 = vld [vmem:[%s1044_s3 + $0x70] sm:$0xff]  ;;  %v722_v57 = vld [vmem:[%s1044_s3 + $0x28] sm:$0xff]  ;;  %v721_v59 = vld [vmem:[%s1044_s3 + $0x20] sm:$0xff] }
   0xf   :  { %v474_v23 = vcvt.s32.f32 %v471_v20  ;;  %v473_v25 = vsel %vm472_vm1, %v469_v21, 1  ;;  %v730_v58 = vld [vmem:[%s1044_s3 + $0x68] sm:$0xff]  ;;  %v729_v60 = vld [vmem:[%s1044_s3 + $0x60] sm:$0xff]  ;;  %v720_v63 = vld [vmem:[%s1044_s3 + $0x18] sm:$0xff] }
  0x10   :  { %141 = vperm.xlu1 %760, %v98_v5   ;;  %v475_v26 = vcvt.s32.f32 %v473_v25  ;;  %v728_v0 = vld [vmem:[%s1044_s3 + $0x58] sm:$0xff]  ;;  %v719_v2 = vld [vmem:[%s1044_s3 + $0x10] sm:$0xff]  ;;  %v726_v5 = vld [vmem:[%s1044_s3 + $0x48] sm:$0xff] }
  0x11   :  { %147 = vperm.xlu0 %759, %v100_v4   ;;  %135 = vperm.xlu2 %761, %v96_v6   ;;  %v727_v3 = vld [vmem:[%s1044_s3 + $0x50] sm:$0xff]  ;;  %v718_v4 = vld [vmem:[%s1044_s3 + $0x8] sm:$0xff]  ;;  %v717_v6 = vld [vmem:[%s1044_s3] sm:$0xff] }
  0x12   :  { %430 = vmatpush.bf16.msra.mxu2 %v723_v52  ;;  %444 = vmatpush.bf16.msra.mxu3 %v731_v53  ;;  %v525_v16 = vld [vmem:[#allocation4 + $0x38] sm:$0xff]  ;;  %v522_v20 = vld [vmem:[#allocation4 + $0x20] sm:$0xff] }
  0x16   :  { %431 = vmatpush.bf16.msra.mxu2 %v722_v57  ;;  %445 = vmatpush.bf16.msra.mxu3 %v730_v58 }
  0x18   :  { %129 = vperm.xlu1 %760, %v94_v7   ;;  %v725_v7 = vld [vmem:[%s1044_s3 + $0x40] sm:$0xff] }
  0x19   :  { %126 = vperm.xlu0 %759, %v93_v8   ;;  %120 = vperm.xlu2 %761, %v91_v9   ;;  %v533_v8 = vld [vmem:[#allocation4 + $0x78] sm:$0xff]  ;;  %v532_v9 = vld [vmem:[#allocation4 + $0x70] sm:$0xff] }
  0x1a   :  { %432 = vmatpush.bf16.msra.mxu2 %v721_v59  ;;  %446 = vmatpush.bf16.msra.mxu3 %v729_v60  ;;  %v762_v60 = vld [vmem:[%s1046_s5] ss:$0 sm:$0xff] }
  0x1e   :  { %433 = vmatpush.bf16.msra.mxu2 %v720_v63  ;;  %447 = vmatpush.bf16.msra.mxu3 %v728_v0 }
  0x20   :  { %51 = vperm.xlu1 %760, %v48_v11   ;;  %v530_v11 = vld [vmem:[#allocation4 + $0x60] sm:$0xff] }
  0x21   :  { %123 = vperm.xlu0 %759, %v92_v10   ;;  %54 = vperm.xlu2 %761, %v49_v12   ;;  %v531_v10 = vld [vmem:[#allocation4 + $0x68] sm:$0xff]  ;;  %v529_v12 = vld [vmem:[#allocation4 + $0x58] sm:$0xff] }
  0x22   :  { %434 = vmatpush.bf16.msra.mxu2 %v719_v2  ;;  %448 = vmatpush.bf16.msra.mxu3 %v727_v3 }
  0x26   :  { %435 = vmatpush.bf16.msra.mxu2 %v718_v4  ;;  %449 = vmatpush.bf16.msra.mxu3 %v726_v5 }
  0x28   :  { %64 = vperm.xlu1 %760, %v59_v14   ;;  %v527_v14 = vld [vmem:[#allocation4 + $0x48] sm:$0xff] }
  0x29   :  { %61 = vperm.xlu0 %759, %v58_v13   ;;  %114 = vperm.xlu2 %761, %v89_v15   ;;  %v528_v13 = vld [vmem:[#allocation4 + $0x50] sm:$0xff]  ;;  %v526_v15 = vld [vmem:[#allocation4 + $0x40] sm:$0xff] }
  0x2a   :  { %436 = vmatpush.bf16.msra.mxu2 %v717_v6  ;;  %450 = vmatpush.bf16.msra.mxu3 %v725_v7 }
  0x30   :  { %108 = vperm.xlu1 %760, %v87_v18   ;;  %v523_v18 = vld [vmem:[#allocation4 + $0x28] sm:$0xff] }
  0x31   :  { %117 = vperm.xlu0 %759, %v90_v17   ;;  %111 = vperm.xlu2 %761, %v88_v19   ;;  %v524_v17 = vld [vmem:[#allocation4 + $0x30] sm:$0xff] }
  0x38   :  { %105 = vperm.xlu1 %760, %v86_v24  }
  0x39   :  { %102 = vperm.xlu0 %759, %v85_v22   ;;  %480 = vperm.xlu2 %761, %v474_v23   ;;  %v521_v22 = vld [vmem:[#allocation4 + $0x18] sm:$0xff] }
  0x41   :  { %485 = vperm.xlu0 %759, %v475_v26  }
  0x63   :  { %v133_v27 = vpop.permute.xlu2 %132 }
  0x64   :  { %vm169_vm13 = vcmp.eq.s32.totalorder %v133_v27, %v927_v32  ;;  %vm170_vm0 = vcmp.eq.s32.totalorder %v133_v27, %v930_v33  ;;  %v520_v27 = vld [vmem:[#allocation4 + $0x10] sm:$0xff] }
  0x6b   :  { %v136_v31 = vpop.permute.xlu2 %135 }
  0x6c   :  { %vm171_vm14 = vcmp.eq.s32.totalorder %v136_v31, %v927_v32  ;;  %vm172_vm1 = vcmp.eq.s32.totalorder %v136_v31, %v930_v33 }
  0x73   :  { %v121_v36 = vpop.permute.xlu2 %120 }
  0x7a   :  { %v139_v30 = vpop.permute.xlu1 %138 }
  0x7b   :  { %v145_v29 = vpop.permute.xlu0 %144  ;;  %vm173_vm10 = vcmp.eq.s32.totalorder %v139_v30, %v927_v32  ;;  %vm174_vm11 = vcmp.eq.s32.totalorder %v139_v30, %v930_v33  ;;  %v55_v40 = vpop.permute.xlu2 %54  ;;  %v518_v30 = vld [vmem:[#allocation4] sm:$0xff] }
  0x7c   :  { %vm177_vm2 = vcmp.eq.s32.totalorder %v145_v29, %v927_v32  ;;  %vm178_vm6 = vcmp.eq.s32.totalorder %v145_v29, %v930_v33  ;;  %v519_v29 = vld [vmem:[#allocation4 + $0x8] sm:$0xff] }
  0x82   :  { %v142_v35 = vpop.permute.xlu1 %141 }
  0x83   :  { %v148_v34 = vpop.permute.xlu0 %147  ;;  %vm175_vm7 = vcmp.eq.s32.totalorder %v142_v35, %v927_v32  ;;  %vm176_vm9 = vcmp.eq.s32.totalorder %v142_v35, %v930_v33  ;;  %v115_v43 = vpop.permute.xlu2 %114 }
  0x84   :  { %vm179_vm3 = vcmp.eq.s32.totalorder %v148_v34, %v927_v32  ;;  %vm180_vm4 = vcmp.eq.s32.totalorder %v148_v34, %v930_v33  ;;  %vm622_vm12 = vmpackc.low %vm175_vm7, %vm173_vm10  ;;  %vm161_vm10 = vcmp.eq.s32.totalorder %v121_v36, %v927_v32 }
  0x85   :  { %vm620_vm5 = vmpackc.low %vm179_vm3, %vm177_vm2 }
  0x86   :  { %621 = vmatpush.bf16.msk.msra.mxu0 %vm620_vm5, %v823_v37  ;;  %vm636_vm8 = vmpackc.low %vm180_vm4, %vm178_vm6 }
  0x87   :  { %637 = vmatpush.bf16.msk.msra.mxu1 %vm636_vm8, %v823_v37  ;;  %vm638_vm15 = vmpackc.low %vm176_vm9, %vm174_vm11 }
  0x88   :  { %vm624_vm2 = vmpackc.low %vm171_vm14, %vm169_vm13  ;;  %vm162_vm13 = vcmp.eq.s32.totalorder %v121_v36, %v930_v33 }
  0x89   :  { %vm640_vm5 = vmpackc.low %vm172_vm1, %vm170_vm0 }
  0x8a   :  { %623 = vmatpush.bf16.msk.msra.mxu0 %vm622_vm12, %v823_v37  ;;  %v130_v38 = vpop.permute.xlu1 %129 }
  0x8b   :  { %639 = vmatpush.bf16.msk.msra.mxu1 %vm638_vm15, %v823_v37  ;;  %v127_v39 = vpop.permute.xlu0 %126  ;;  %vm167_vm3 = vcmp.eq.s32.totalorder %v130_v38, %v927_v32  ;;  %vm168_vm6 = vcmp.eq.s32.totalorder %v130_v38, %v930_v33  ;;  %v112_v56 = vpop.permute.xlu2 %111 }
  0x8c   :  { %vm165_vm4 = vcmp.eq.s32.totalorder %v127_v39, %v927_v32  ;;  %vm166_vm7 = vcmp.eq.s32.totalorder %v127_v39, %v930_v33 }
  0x8d   :  { %vm626_vm8 = vmpackc.low %vm167_vm3, %vm165_vm4  ;;  %vm57_vm3 = vcmp.ge.s32.totalorder %v927_v32, %v55_v40 }
  0x8e   :  { %625 = vmatpush.bf16.msk.msra.mxu0 %vm624_vm2, %v823_v37  ;;  %vm642_vm9 = vmpackc.low %vm168_vm6, %vm166_vm7  ;;  %vm157_vm6 = vcmp.eq.s32.totalorder %v115_v43, %v927_v32 }
  0x8f   :  { %641 = vmatpush.bf16.msk.msra.mxu1 %vm640_vm5, %v823_v37 }
  0x92   :  { %627 = vmatpush.bf16.msk.msra.mxu0 %vm626_vm8, %v823_v37  ;;  %v52_v42 = vpop.permute.xlu1 %51 }
  0x93   :  { %643 = vmatpush.bf16.msk.msra.mxu1 %vm642_vm9, %v823_v37  ;;  %v124_v41 = vpop.permute.xlu0 %123  ;;  %vm56_vm2 = vcmp.ge.s32.totalorder %v927_v32, %v52_v42  ;;  %vm158_vm9 = vcmp.eq.s32.totalorder %v115_v43, %v930_v33  ;;  %v481_v28 = vpop.permute.xlu2 %480 }
  0x94   :  { %vm163_vm11 = vcmp.eq.s32.totalorder %v124_v41, %v927_v32  ;;  %vm164_vm12 = vcmp.eq.s32.totalorder %v124_v41, %v930_v33  ;;  %763 = vrcp.f32 %v481_v28  ;;  %v499_v40 = vand.u32 2147483648, %v481_v28 }
  0x95   :  { %vm628_vm14 = vmpackc.low %vm163_vm11, %vm161_vm10  ;;  %v497_v41 = vand.u32 2147483647, %v481_v28 }
  0x96   :  { %629 = vmatpush.bf16.msk.msra.mxu0 %vm628_vm14, %v823_v37  ;;  %vm644_vm15 = vmpackc.low %vm164_vm12, %vm162_vm13  ;;  %vm155_vm14 = vcmp.eq.s32.totalorder %v112_v56, %v927_v32 }
  0x97   :  { %645 = vmatpush.bf16.msk.msra.mxu1 %vm644_vm15, %v823_v37  ;;  %vm156_vm15 = vcmp.eq.s32.totalorder %v112_v56, %v930_v33 }
  0x9a   :  { %v65_v45 = vpop.permute.xlu1 %64 }
  0x9b   :  { %v62_v44 = vpop.permute.xlu0 %61  ;;  %vm67_vm1 = vcmp.lt.s32.totalorder %v927_v32, %v65_v45  ;;  %v500_v45 = vor.u32 1.1754944e-38, %v499_v40 }
  0x9c   :  { %vm66_vm0 = vcmp.lt.s32.totalorder %v927_v32, %v62_v44  ;;  %vm69_vm5 = vmand %vm57_vm3, %vm67_vm1 }
  0x9d   :  { %vm68_vm4 = vmand %vm56_vm2, %vm66_vm0  ;;  %v583_v50 = vsel %vm69_vm5, 1.0, %v824_v46 }
  0x9e   :  { %v582_v47 = vsel %vm68_vm4, 1.0, %v824_v46 }
  0x9f   :  { %v734_v51 = vpack.c.bf16 %v583_v50, %v582_v47 }
  0xa1   :  { %735 = vst [vmem:[#allocation3] sm:$0xff] %v734_v51  }
  0xa2   :  { %v109_v55 = vpop.permute.xlu1 %108 }
  0xa3   :  { %v118_v54 = vpop.permute.xlu0 %117  ;;  %vm153_vm11 = vcmp.eq.s32.totalorder %v109_v55, %v927_v32  ;;  %vm154_vm13 = vcmp.eq.s32.totalorder %v109_v55, %v930_v33 }
  0xa4   :  { %vm159_vm7 = vcmp.eq.s32.totalorder %v118_v54, %v927_v32  ;;  %vm160_vm8 = vcmp.eq.s32.totalorder %v118_v54, %v930_v33  ;;  %vm632_vm0 = vmpackc.low %vm155_vm14, %vm153_vm11  ;;  %vm498_vm11 = vcmp.eq.f32.partialorder %v497_v41, 8.507059e+37 }
  0xa5   :  { %vm630_vm10 = vmpackc.low %vm159_vm7, %vm157_vm6 }
  0xa6   :  { %631 = vmatpush.bf16.msk.msra.mxu0 %vm630_vm10, %v823_v37  ;;  %vm646_vm12 = vmpackc.low %vm160_vm8, %vm158_vm9  ;;  %vm493_vm9 = vweird.f32 %v481_v28 }
  0xa7   :  { %647 = vmatpush.bf16.msk.msra.mxu1 %vm646_vm12, %v823_v37  ;;  %vm648_vm1 = vmpackc.low %vm156_vm15, %vm154_vm13 }
  0xa8   :  { %v716_v1 = vld [vmem:[#allocation3] sm:$0xff] }
  0xaa   :  { %633 = vmatpush.bf16.msk.msra.mxu0 %vm632_vm0, %v823_v37  ;;  %v106_v62 = vpop.permute.xlu1 %105 }
  0xab   :  { %649 = vmatpush.bf16.msk.msra.mxu1 %vm648_vm1, %v823_v37  ;;  %v103_v61 = vpop.permute.xlu0 %102  ;;  %vm151_vm4 = vcmp.eq.s32.totalorder %v106_v62, %v927_v32  ;;  %vm152_vm5 = vcmp.eq.s32.totalorder %v106_v62, %v930_v33 }
  0xac   :  { %vm149_vm2 = vcmp.eq.s32.totalorder %v103_v61, %v927_v32  ;;  %vm150_vm3 = vcmp.eq.s32.totalorder %v103_v61, %v930_v33  ;;  %v764_v32 = vpop.eup %763 }
  0xad   :  { %vm634_vm6 = vmpackc.low %vm151_vm4, %vm149_vm2  ;;  %v489_v33 = vmul.f32 %v764_v32, %v481_v28  ;;  %vm494_vm8 = vweird.f32 %v764_v32 }
  0xae   :  { %vm650_vm7 = vmpackc.low %vm152_vm5, %vm150_vm3  ;;  %635 = vmatpush.bf16.msk.msra.mxu0 %vm634_vm6, %v823_v37 }
  0xaf   :  { %651 = vmatpush.bf16.msk.msra.mxu1 %vm650_vm7, %v823_v37  ;;  %v490_v34 = vsub.f32 1.0, %v489_v33  ;;  %vm495_vm10 = vmor %vm493_vm9, %vm494_vm8 }
  0xb1   :  { %277 = vmatmul.bf16.vlgmr.msra.gmra.mxu0 %v716_v1  ;;  %v491_v36 = vmul.f32 %v764_v32, %v490_v34 }
  0xb2   :  { %291 = vmatmul.bf16.vlgmr.msra.gmra.mxu1 %v716_v1  ;;  %538 = vmatpush.msrb.mxu0 %v533_v8 }
  0xb3   :  { %736 = vmatpush.msrb.mxu1 %v533_v8  ;;  %v486_v31 = vpop.permute.xlu0 %485  ;;  %v492_v39 = vadd.f32 %v764_v32, %v491_v36 }
  0xb4   :  { %539 = vmatpush.msrb.mxu0 %v532_v9  ;;  %765 = vrcp.f32 %v486_v31  ;;  %v514_v51 = vand.u32 2147483648, %v486_v31  ;;  %vm508_vm13 = vweird.f32 %v486_v31  ;;  %v512_v52 = vand.u32 2147483647, %v486_v31 }
  0xb5   :  { %737 = vmatpush.msrb.mxu1 %v532_v9  ;;  %v496_v44 = vsel %vm495_vm10, %v764_v32, %v492_v39 }
  0xb6   :  { %540 = vmatpush.msrb.mxu0 %v531_v10  ;;  %v501_v48 = vsel %vm498_vm11, %v500_v45, %v496_v44  ;;  %v515_v55 = vor.u32 1.1754944e-38, %v514_v51  ;;  %vm513_vm15 = vcmp.eq.f32.partialorder %v512_v52, 8.507059e+37 }
  0xb7   :  { %738 = vmatpush.msrb.mxu1 %v531_v10 }
  0xb8   :  { %541 = vmatpush.msrb.mxu0 %v530_v11 }
  0xb9   :  { %739 = vmatpush.msrb.mxu1 %v530_v11 }
  0xba   :  { %542 = vmatpush.msrb.mxu0 %v529_v12  ;;  %v766_v35 = vpop.eup %765 }
  0xbb   :  { %740 = vmatpush.msrb.mxu1 %v529_v12  ;;  %v504_v37 = vmul.f32 %v766_v35, %v486_v31  ;;  %vm509_vm12 = vweird.f32 %v766_v35 }
  0xbc   :  { %543 = vmatpush.msrb.mxu0 %v528_v13  ;;  %vm510_vm14 = vmor %vm508_vm13, %vm509_vm12 }
  0xbd   :  { %741 = vmatpush.msrb.mxu1 %v528_v13  ;;  %v505_v38 = vsub.f32 1.0, %v504_v37 }
  0xbe   :  { %544 = vmatpush.msrb.mxu0 %v527_v14 }
  0xbf   :  { %742 = vmatpush.msrb.mxu1 %v527_v14  ;;  %v506_v42 = vmul.f32 %v766_v35, %v505_v38 }
  0xc0   :  { %545 = vmatpush.msrb.mxu0 %v526_v15 }
  0xc1   :  { %743 = vmatpush.msrb.mxu1 %v526_v15  ;;  %v507_v50 = vadd.f32 %v766_v35, %v506_v42 }
  0xc2   :  { %546 = vmatpush.msrb.mxu0 %v525_v16 }
  0xc3   :  { %744 = vmatpush.msrb.mxu1 %v525_v16  ;;  %v511_v54 = vsel %vm510_vm14, %v766_v35, %v507_v50 }
  0xc4   :  { %547 = vmatpush.msrb.mxu0 %v524_v17  ;;  %v516_v58 = vsel %vm513_vm15, %v515_v55, %v511_v54 }
  0xc5   :  { %745 = vmatpush.msrb.mxu1 %v524_v17 }
  0xc6   :  { %548 = vmatpush.msrb.mxu0 %v523_v18 }
  0xc7   :  { %746 = vmatpush.msrb.mxu1 %v523_v18 }
  0xc8   :  { %549 = vmatpush.msrb.mxu0 %v522_v20 }
  0xc9   :  { %747 = vmatpush.msrb.mxu1 %v522_v20 }
  0xca   :  { %550 = vmatpush.msrb.mxu0 %v521_v22 }
  0xcb   :  { %748 = vmatpush.msrb.mxu1 %v521_v22 }
  0xcc   :  { %551 = vmatpush.msrb.mxu0 %v520_v27 }
  0xcd   :  { %749 = vmatpush.msrb.mxu1 %v520_v27 }
  0xce   :  { %552 = vmatpush.msrb.mxu0 %v519_v29 }
  0xcf   :  { %750 = vmatpush.msrb.mxu1 %v519_v29 }
  0xd0   :  { %553 = vmatpush.msrb.mxu0 %v518_v30 }
  0xd1   :  { %751 = vmatpush.msrb.mxu1 %v518_v30 }
 0x12e   :  { %v278_v19 = vpop.f32.mrf.mxu0 }
 0x12f   :  { %v292_v21 = vpop.f32.mrf.mxu1 }
 0x136   :  { %v280_v23 = vpop.f32.mrf.mxu0 }
 0x137   :  { %v299_v24 = vpack.c.bf16 %v280_v23, %v278_v19  ;;  %v294_v25 = vpop.f32.mrf.mxu1 }
 0x138   :  { %v300_v26 = vpack.c.bf16 %v294_v25, %v292_v21 }
 0x139   :  { %437 = vmatmul.bf16.vlgmr.msra.gmra.mxu2 %v299_v24 }
 0x13a   :  { %451 = vmatmul.bf16.vlgmr.msra.gmra.mxu3 %v300_v26 }
 0x1bc   :  { %v438_v43 = vpop.f32.mrf.mxu2 }
 0x1bd   :  { %v452_v46 = vpop.f32.mrf.mxu3 }
 0x1be   :  { %v453_v47 = vadd.f32 %v452_v46, %v438_v43 }
 0x1c0   :  { %v502_v49 = vmul.f32 %v501_v48, %v453_v47 }
 0x1c2   :  { %554 = vmatmul.f32.vlgmr.msrb.gmra.mxu0 %v502_v49 }
 0x1c4   :  { %v440_v53 = vpop.f32.mrf.mxu2 }
 0x1c5   :  { %v454_v56 = vpop.f32.mrf.mxu3 }
 0x1c6   :  { %v455_v57 = vadd.f32 %v454_v56, %v440_v53 }
 0x1c8   :  { %v517_v59 = vmul.f32 %v516_v58, %v455_v57 }
 0x1ca   :  { %557 = vmatmul.f32.vlgmr.msrb.gmra.mxu1 %v517_v59 }
 0x23f   :  { %v555_v61 = vpop.f32.mrf.mxu0 }
 0x240   :  { %v556_v62 = vadd.f32 %v762_v60, %v555_v61 }
 0x242   :  { %561 = vst [vmem:[#allocation7] sm:$0xff] %v556_v62 }
 0x247   :  { %v558_v63 = vpop.f32.mrf.mxu1 }
 0x248   :  { %v559_v0 = vadd.f32 %v762_v60, %v558_v63 }
 0x24a   :  { %562 = vst [vmem:[#allocation7 + $0x8] sm:$0xff] %v559_v0 }
 0x24b   :  { %575 = dma.vmem_to_hbm [thread:$0]  %s568_s25, 256, %s570_s4, [#allocation6], %s820_s26, %s820_s26, %s821_s27  }
 0x24c   :  { %817 = dma.done.wait [#allocation6], 256  }
 0x24d   :  { %818 = vsyncadd [#allocation6], 4294967040 }
 0x24e   :  { %580 = vsyncpa [#allocation5], 1 }
 0x24f   :  { %581 = vsyncpa [#allocation6], 1 }

</bundles_post_ra>
